<compile_context>
chip_gen: v5e
topology: v5e:2x2
jax: 0.10.0
libtpu: 0.0.40
codegen_flags: <defaults>
</compile_context>

<pallas_src>
import functools
import math

import jax
import jax.numpy as jnp
from jax import lax
from jax.experimental import pallas as pl
from jax.experimental.pallas import tpu as pltpu


# ----------------------------------------------------------------------------
# fused kernel: per block (B, C, HW):
#   build banded conv matrix from SMEM weights, then for each image:
#   lane-reduce pool -> (C,C)@(C,1) conv -> sigmoid / h_sigmoid -> scale & store
# ----------------------------------------------------------------------------
def _eca_kernel(use_sigmoid, inv_hw, w_ref, x_ref, o_ref):
    B, C, _ = x_ref.shape
    k = w_ref.shape[0]
    half = k // 2

    # Banded conv1d matrix built in-registers from the SMEM weights:
    #   band[c, i] = w[i - c + half]  if 0 <= i - c + half < k else 0
    row = lax.broadcasted_iota(jnp.int32, (C, C), 0)      # output channel c
    col = lax.broadcasted_iota(jnp.int32, (C, C), 1)      # input channel i
    diff = col - row                                       # i - c
    band = jnp.zeros((C, C), jnp.float32)
    for j in range(k):
        band = jnp.where(diff == (j - half), w_ref[j], band)

    def body(b, carry):
        xb = x_ref[b]                                                  # (C, HW)
        # global average pool over the spatial (lane) axis, f32 accumulation
        pooled = jnp.sum(xb.astype(jnp.float32), axis=-1,
                         keepdims=True) * inv_hw                        # (C, 1)
        gate = jnp.dot(band, pooled,
                       preferred_element_type=jnp.float32)              # (C, 1)
        if use_sigmoid:
            gate = 1.0 / (1.0 + jnp.exp(-gate))
        else:  # h_sigmoid: relu6(x + 3) / 6
            gate = jnp.clip(gate + 3.0, 0.0, 6.0) * (1.0 / 6.0)
        o_ref[b] = (xb * gate.astype(xb.dtype)).astype(o_ref.dtype)     # broadcast over lanes
        return carry

    lax.fori_loop(0, B, body, 0)


def _largest_divisor_leq(n, cap):
    cap = max(1, min(n, cap))
    for d in range(cap, 0, -1):
        if n % d == 0:
            return d
    return 1


def eca_forward(x_nchw, conv_w, use_sigmoid=True):
    """ECALayer forward.  x_nchw: (N, C, H, W).  conv_w: (k,) conv1d weight."""
    N, C, H, W = x_nchw.shape
    HW = H * W
    x3 = x_nchw.reshape(N, C, HW)                          # spatial axis -> lanes
    conv_w = conv_w.astype(jnp.float32)

    itemsize = x3.dtype.itemsize
    img_bytes = C * HW * itemsize

    # VMEM budget aware of the actual chip (v7x: 64 MiB, v5e/v6e: 128 MiB).
    try:
        phys_vmem = int(pltpu.get_tpu_info().vmem_capacity_bytes)
    except Exception:
        phys_vmem = 64 << 20                               # conservative (v7x) fallback
    vmem_budget = min(40 << 20, int(phys_vmem * 0.6))

    # Batch several images per grid step (target ~8 MiB per block), capped so that
    # in + out blocks, double-buffered (4x), fit the VMEM budget.
    want = -(-(8 << 20) // img_bytes)                      # ceil(8 MiB / image)
    cap = max(1, vmem_budget // (4 * img_bytes))
    B = _largest_divisor_leq(N, min(want, cap))
    # TODO(synk): if a single image already exceeds the budget (4*img_bytes > vmem_budget),
    # fall back to a two-pass pool-then-scale kernel tiled over HW.

    grid = (N // B,)
    block_bytes = B * img_bytes
    vmem_limit = int(min(max(4 * block_bytes + C * C * 4 + (8 << 20), 32 << 20),
                         int(phys_vmem * 0.75)))

    kernel = functools.partial(_eca_kernel, bool(use_sigmoid), 1.0 / HW)

    out = pl.pallas_call(
        kernel,
        out_shape=jax.ShapeDtypeStruct((N, C, HW), x3.dtype),
        grid_spec=pltpu.PrefetchScalarGridSpec(
            num_scalar_prefetch=1,                          # conv_w -> SMEM
            grid=grid,
            in_specs=[pl.BlockSpec((B, C, HW), lambda g, w: (g, 0, 0))],
            out_specs=pl.BlockSpec((B, C, HW), lambda g, w: (g, 0, 0)),
        ),
        compiler_params=pltpu.CompilerParams(
            dimension_semantics=("parallel",),
            vmem_limit_bytes=vmem_limit,
        ),
    )(conv_w, x3)
    return out.reshape(N, C, H, W)


# ----------------------------------------------------------------------------
# pure-JAX reference for self-checking
# ----------------------------------------------------------------------------
def reference_forward(x, conv_w, use_sigmoid=True):
    N, C, H, W = x.shape
    k = conv_w.shape[0]
    half = k // 2
    pooled = jnp.mean(x.astype(jnp.float32), axis=(2, 3))  # (N, C)
    padded = jnp.pad(pooled, ((0, 0), (half, half)))
    gate = jnp.zeros_like(pooled)
    for j in range(k):
        gate = gate + conv_w[j] * padded[:, j:j + C]
    if use_sigmoid:
        gate = 1.0 / (1.0 + jnp.exp(-gate))
    else:
        gate = jnp.clip(gate + 3.0, 0.0, 6.0) * (1.0 / 6.0)
    return x * gate.astype(x.dtype)[:, :, None, None]


# ----------------------------------------------------------------------------
# demo / self-check
# ----------------------------------------------------------------------------
if __name__ == "__main__":
    # ECALayer(channel=32, gamma=2, b=1)  ->  t = int((log2(32)+1)/2) = 3, k = 3
    N, C, H, W = 2, 32, 16, 16
    gamma, b = 2, 1
    t = int(abs((math.log2(C) + b) / gamma))
    k = t if t % 2 else t + 1

    key = jax.random.PRNGKey(0)
    kx, kw = jax.random.split(key)
    x = jax.random.normal(kx, (N, C, H, W), jnp.float32)
    conv_w = 0.5 * jax.random.normal(kw, (k,), jnp.float32)

    # sigmoid=True path (module default)
    y = jax.block_until_ready(eca_forward(x, conv_w, use_sigmoid=True))
    y_ref = jax.block_until_ready(reference_forward(x, conv_w, use_sigmoid=True))
    assert y.shape == (N, C, H, W)
    assert jnp.allclose(y, y_ref, rtol=1e-4, atol=1e-4), (
        float(jnp.max(jnp.abs(y - y_ref))))

    # h_sigmoid path (sigmoid=False in the PyTorch module)
    y2 = jax.block_until_ready(eca_forward(x, conv_w, use_sigmoid=False))
    y2_ref = jax.block_until_ready(reference_forward(x, conv_w, use_sigmoid=False))
    assert jnp.allclose(y2, y2_ref, rtol=1e-4, atol=1e-4), (
        float(jnp.max(jnp.abs(y2 - y2_ref))))

    print("KERNEL_OK")
</pallas_src>

<mosaic_0001>
module attributes {stable_mosaic.version = 11 : i64} {
  func.func @_eca_kernel(%arg0: i32, %arg1: memref<3xf32, #tpu.memory_space<smem>>, %arg2: memref<2x32x256xf32, #tpu.memory_space<vmem>>, %arg3: memref<2x32x256xf32, #tpu.memory_space<vmem>>) attributes {dimension_semantics = [#tpu.dimension_semantics<parallel>], iteration_bounds = array<i64: 1>, scalar_prefetch = 1 : i64, scratch_operands = 0 : i64, tpu.core_type = #tpu.core_type<tc>, window_params = [{transform_indices = @transform_0, window_bounds = array<i64: 2, 32, 256>}, {transform_indices = @transform_1, window_bounds = array<i64: 2, 32, 256>}]} {
    %0 = tpu.iota {dimensions = array<i32: 0>} : vector<32x32xi32>
    %1 = tpu.iota {dimensions = array<i32: 1>} : vector<32x32xi32>
    %2 = arith.subi %1, %0 : vector<32x32xi32>
    %cst = arith.constant 0.000000e+00 : f32
    %3 = vector.broadcast %cst : f32 to vector<32x32xf32>
    %c-1_i32 = arith.constant -1 : i32
    %4 = vector.broadcast %c-1_i32 : i32 to vector<32x32xi32>
    %5 = arith.cmpi eq, %2, %4 : vector<32x32xi32>
    %c0 = arith.constant 0 : index
    %6 = memref.load %arg1[%c0] : memref<3xf32, #tpu.memory_space<smem>>
    %7 = vector.broadcast %6 : f32 to vector<32x32xf32>
    %8 = arith.select %5, %7, %3 : vector<32x32xi1>, vector<32x32xf32>
    %c0_i32 = arith.constant 0 : i32
    %9 = vector.broadcast %c0_i32 : i32 to vector<32x32xi32>
    %10 = arith.cmpi eq, %2, %9 : vector<32x32xi32>
    %c1 = arith.constant 1 : index
    %11 = memref.load %arg1[%c1] : memref<3xf32, #tpu.memory_space<smem>>
    %12 = vector.broadcast %11 : f32 to vector<32x32xf32>
    %13 = arith.select %10, %12, %8 : vector<32x32xi1>, vector<32x32xf32>
    %c1_i32 = arith.constant 1 : i32
    %14 = vector.broadcast %c1_i32 : i32 to vector<32x32xi32>
    %15 = arith.cmpi eq, %2, %14 : vector<32x32xi32>
    %c2 = arith.constant 2 : index
    %16 = memref.load %arg1[%c2] : memref<3xf32, #tpu.memory_space<smem>>
    %17 = vector.broadcast %16 : f32 to vector<32x32xf32>
    %18 = arith.select %15, %17, %13 : vector<32x32xi1>, vector<32x32xf32>
    %c0_i32_0 = arith.constant 0 : i32
    %c2_i32 = arith.constant 2 : i32
    %19 = arith.addi %c0_i32_0, %c2_i32 : i32
    %c1_i32_1 = arith.constant 1 : i32
    scf.for %arg4 = %c0_i32_0 to %19 step %c1_i32_1  : i32 {
      %20 = arith.index_cast %arg4 : i32 to index
      %c0_3 = arith.constant 0 : index
      %c0_4 = arith.constant 0 : index
      %21 = vector.load %arg2[%20, %c0_3, %c0_4] : memref<2x32x256xf32, #tpu.memory_space<vmem>>, vector<1x32x256xf32>
      %22 = vector.shape_cast %21 : vector<1x32x256xf32> to vector<32x256xf32>
      %cst_5 = arith.constant dense<0.000000e+00> : vector<32xf32>
      %23 = vector.multi_reduction <add>, %22, %cst_5 [1] : vector<32x256xf32> to vector<32xf32>
      %24 = vector.shape_cast %23 : vector<32xf32> to vector<32x1xf32>
      %cst_6 = arith.constant 3.906250e-03 : f32
      %25 = vector.broadcast %cst_6 : f32 to vector<32x1xf32>
      %26 = arith.mulf %24, %25 : vector<32x1xf32>
      %cst_7 = arith.constant dense<0.000000e+00> : vector<32x1xf32>
      %27 = tpu.matmul %18, %26, %cst_7 {dimension_numbers = #tpu.dot_dimension_numbers<[1], [0], [0], [1], [0, 0, 1, 1], [], []>} : vector<32x32xf32>, vector<32x1xf32>, vector<32x1xf32> -> vector<32x1xf32>
      %cst_8 = arith.constant 0.000000e+00 : f32
      %28 = vector.broadcast %cst_8 : f32 to vector<32x1xf32>
      %29 = arith.subf %28, %27 : vector<32x1xf32>
      %30 = math.exp %29 : vector<32x1xf32>
      %cst_9 = arith.constant 1.000000e+00 : f32
      %31 = vector.broadcast %cst_9 : f32 to vector<32x1xf32>
      %32 = arith.addf %31, %30 : vector<32x1xf32>
      %cst_10 = arith.constant 1.000000e+00 : f32
      %33 = vector.broadcast %cst_10 : f32 to vector<32x1xf32>
      %34 = arith.divf %33, %32 : vector<32x1xf32>
      %35 = vector.broadcast %34 : vector<32x1xf32> to vector<32x256xf32>
      %36 = arith.mulf %22, %35 : vector<32x256xf32>
      %37 = arith.index_cast %arg4 : i32 to index
      %c0_11 = arith.constant 0 : index
      %c0_12 = arith.constant 0 : index
      %38 = vector.load %arg3[%37, %c0_11, %c0_12] : memref<2x32x256xf32, #tpu.memory_space<vmem>>, vector<1x32x256xf32>
      %39 = vector.shape_cast %38 : vector<1x32x256xf32> to vector<32x256xf32>
      %40 = vector.shape_cast %36 : vector<32x256xf32> to vector<1x32x256xf32>
      tpu.vector_store %arg3[%37, %c0_11, %c0_12], %40 {strides = array<i32>} : memref<2x32x256xf32, #tpu.memory_space<vmem>>, vector<1x32x256xf32>,
    }
    %c2_i32_2 = arith.constant 2 : i32
    return
  }
  func.func @transform_0(%arg0: i32, %arg1: memref<3xf32, #tpu.memory_space<smem>>) -> (i32, i32, i32) {
    %c0_i32 = arith.constant 0 : i32
    %c0_i32_0 = arith.constant 0 : i32
    %c0_i32_1 = arith.constant 0 : i32
    return %arg0, %c0_i32, %c0_i32_0 : i32, i32, i32
  }
  func.func @transform_1(%arg0: i32, %arg1: memref<3xf32, #tpu.memory_space<smem>>) -> (i32, i32, i32) {
    %c0_i32 = arith.constant 0 : i32
    %c0_i32_0 = arith.constant 0 : i32
    %c0_i32_1 = arith.constant 0 : i32
    return %arg0, %c0_i32, %c0_i32_0 : i32, i32, i32
  }
}

</mosaic_0001>

<bundles_post_ra>
// kernel: tpu_custom_call.1
= control target key start
LH: loop header
LB: loop body
LE: loop exit
PB: predicated region body
PF: predicated region fallthrough
CT: control target
= control target key end

     0   :  { %s422_s12 = smov [#allocation3]   ;;  %s535_s0 = inlined_call_operand.hbm [shape: f32[3], index: 0, kind: input, shape index: {}]   ;;  %s536_s1 = inlined_call_operand.hbm [shape: f32[2,32,256], index: 1, kind: input, shape index: {}]   ;;  %s537_s2 = inlined_call_operand.hbm [shape: f32[2,32,256], index: 2, kind: output, shape index: {}]  }
   0x1   :  { %s8_s11 = sshll.u32 %s535_s0, 4  ;;  %s9_s11 = int_to_ptr.hbm [resolvable:$true] %s8_s11 }
   0x2   :  { %11 = dma.hbm_to_smem %s9_s11, 16, %s422_s12, [#allocation2] }
   0x3   :  { %412 = dma.done.wait [#allocation2], 16 }
   0x4   :  { %413 = vsyncadd [#allocation2], 4294967280 }
   0x5   :  { %14 = sfence }
   0x6   :  { %15 = vsyncpa [#allocation5], 0 }
   0x7   :  { %16 = vsyncpa [#allocation6], 0  ;;  %s21_s15 = sshll.u32 %s536_s1, 4  ;;  %s423_s16 = smov [#allocation4]   ;;  %s22_s15 = int_to_ptr.hbm [resolvable:$true] %s21_s15 }
   0x8   :  { %s23_s17 = sshll.u32 %s423_s16, 4  ;;  %s424_s18 = smov 256   ;;  %s24_s17 = int_to_ptr.vmem [resolvable:$true] %s23_s17 }
   0x9   :  { %s425_s19 = smov 16  }
   0xa   :  { %29 = dma.hbm_to_vmem [thread:$0]  %s22_s15, 2048, %s24_s17, [#allocation5], %s424_s18, %s424_s18, %s425_s19  }
   0xb   :  { %414 = dma.done.wait [#allocation5], 2048  }
   0xc   :  { %415 = vsyncadd [#allocation5], 4294965248  ;;  %v34_v0 = vlaneseq  ;;  %s49_s0 = sld [smem:[#allocation3]]  ;;  %s461_s21 = smov 0  }
   0xd   :  { %s292_s20 = sld [smem:[#allocation3 + $0x1]] }
   0xe   :  { %v35_v1 = vshrl.u32 %v34_v0, 7  ;;  %v40_v2 = vand.u32 127, %v34_v0  ;;  %s293_s1 = sld [smem:[#allocation3 + $0x2]] }
  0x10   :  { %v36_v3 = vadd.s32 8, %v35_v1  ;;  %v37_v4 = vadd.s32 16, %v35_v1  ;;  %v38_v5 = vadd.s32 24, %v35_v1  ;;  %v41_v6 = vsub.s32 %v40_v2, %v35_v1 }
  0x12   :  { %v42_v7 = vsub.s32 %v40_v2, %v36_v3  ;;  %v43_v8 = vsub.s32 %v40_v2, %v37_v4  ;;  %v44_v9 = vsub.s32 %v40_v2, %v38_v5  ;;  %vm45_vm0 = vcmp.eq.s32.totalorder %v41_v6, 4294967295 }
  0x13   :  { %v50_v10 = vstv %s49_s0  ;;  %vm55_vm1 = vcmp.eq.s32.totalorder %v41_v6, 0  ;;  %vm65_vm2 = vcmp.eq.s32.totalorder %v41_v6, 1  ;;  %v60_v15 = vstv %s292_s20 }
  0x14   :  { %vm46_vm3 = vcmp.eq.s32.totalorder %v42_v7, 4294967295  ;;  %vm47_vm4 = vcmp.eq.s32.totalorder %v43_v8, 4294967295  ;;  %vm48_vm5 = vcmp.eq.s32.totalorder %v44_v9, 4294967295  ;;  %v51_v11 = vsel %vm45_vm0, %v50_v10, 0.0 }
  0x15   :  { %v52_v12 = vsel %vm46_vm3, %v50_v10, 0.0  ;;  %v53_v13 = vsel %vm47_vm4, %v50_v10, 0.0  ;;  %v54_v14 = vsel %vm48_vm5, %v50_v10, 0.0  ;;  %vm56_vm6 = vcmp.eq.s32.totalorder %v42_v7, 0 }
  0x16   :  { %vm57_vm7 = vcmp.eq.s32.totalorder %v43_v8, 0  ;;  %vm58_vm8 = vcmp.eq.s32.totalorder %v44_v9, 0  ;;  %vm66_vm9 = vcmp.eq.s32.totalorder %v42_v7, 1  ;;  %v61_v16 = vsel %vm55_vm1, %v60_v15, %v51_v11 }
  0x17   :  { %v62_v17 = vsel %vm56_vm6, %v60_v15, %v52_v12  ;;  %v63_v18 = vsel %vm57_vm7, %v60_v15, %v53_v13  ;;  %v64_v19 = vsel %vm58_vm8, %v60_v15, %v54_v14  ;;  %vm67_vm10 = vcmp.eq.s32.totalorder %v43_v8, 1 }
  0x18   :  { %vm68_vm11 = vcmp.eq.s32.totalorder %v44_v9, 1  ;;  %v70_v20 = vstv %s293_s1 }
  0x19   :  { %v453_v21 = vsel %vm65_vm2, %v70_v20, %v61_v16  ;;  %v455_v22 = vsel %vm66_vm9, %v70_v20, %v62_v17  ;;  %v457_v23 = vsel %vm67_vm10, %v70_v20, %v63_v18  ;;  %v459_v24 = vsel %vm68_vm11, %v70_v20, %v64_v19 }
  0x1a LB: > { %s301_s22 = sshll.u32 %s420_s21, 6  ;;  %vm108_vm12 = vcmask 261120   ;;  %v426_v45 = vmov 0   ;;  %s80_s21 = sadd.s32 1, %s420_s21   ;;  %s420_s21 = sphi %s461_s21, %s80_s21  }
  0x1b   : > { %s83_s23 = scalar_lea.vmem [#allocation4], %s301_s22  ;;  %331 = vset.pattern.permute.xlu1 %v426_v45  ;;  %330 = vset.pattern.permute.xlu0 %v426_v45  ;;  %s255_s24 = scalar_lea.vmem [#allocation7], %s301_s22 }
  0x1c   : > { %v469_v25 = vld [vmem:[%s83_s23 + $0x30] sm:$0xff]  ;;  %v471_v26 = vld [vmem:[%s83_s23 + $0x38] sm:$0xff]  ;;  %v481_v31 = vld [vmem:[%s83_s23 + $0x20] sm:$0xff]  ;;  %329 = vset.pattern.permute.xlu2 %v426_v45  ;;  %p77_p0 = scmp.ge.s32.totalorder %s80_s21, 2  }
  0x1d   : > { %v473_v27 = vld [vmem:[%s83_s23 + $0x10] sm:$0xff]  ;;  %v101_v28 = vadd.f32 %v471_v26, %v469_v25  ;;  %v477_v29 = vld [vmem:[%s83_s23 + $0x18] sm:$0xff]  ;;  %v483_v32 = vld [vmem:[%s83_s23 + $0x28] sm:$0xff]  ;;  %s270_s27 = sshll.u32 (%p77_p0), %s537_s2, 4  ;;  %s427_s28 = smov (%p77_p0), [#allocation7]   ;;  %s271_s27 = int_to_ptr.hbm [resolvable:$true] %s270_s27 }
  0x1e   : > { %v95_v30 = vadd.f32 %v477_v29, %v473_v27  ;;  %v485_v33 = vld [vmem:[%s83_s23] sm:$0xff]  ;;  %v487_v34 = vld [vmem:[%s83_s23 + $0x8] sm:$0xff]  ;;  %v98_v35 = vadd.f32 %v483_v32, %v481_v31  ;;  %s268_s29 = sshll.u32 (%p77_p0), %s427_s28, 4  ;;  %s269_s29 = int_to_ptr.vmem [resolvable:$true] %s268_s29 }
  0x1f   : > { %102 = vadd.xlane.f32.xlu0 %v101_v28  ;;  %v92_v36 = vadd.f32 %v487_v34, %v485_v33 }
  0x20   : > { %96 = vadd.xlane.f32.xlu1 %v95_v30 }
  0x27   : > { %99 = vadd.xlane.f32.xlu0 %v98_v35 }
  0x28   : > { %93 = vadd.xlane.f32.xlu1 %v92_v36 }
  0x92   : > { %v103_v37 = vpop.xlane.xlu0 %102 }
  0x93   : > { %v107_v38 = vmul.f32 0.00390625, %v103_v37  ;;  %v97_v39 = vpop.xlane.xlu1 %96 }
  0x94   : > { %v105_v43 = vmul.f32 0.00390625, %v97_v39 }
  0x95   : > { %133 = vmatpush.msra.mxu0 %v107_v38  ;;  %303 = vmatpush.msra.mxu1 %v107_v38 }
  0x96   : > { %304 = vmatpush.msra.mxu2 %v107_v38  ;;  %305 = vmatpush.msra.mxu3 %v107_v38 }
  0x9a   : > { %v100_v40 = vpop.xlane.xlu0 %99 }
  0x9b   : > { %v106_v41 = vmul.f32 0.00390625, %v100_v40  ;;  %v94_v42 = vpop.xlane.xlu1 %93 }
  0x9c   : > { %v104_v44 = vmul.f32 0.00390625, %v94_v42 }
  0x9d   : > { %134 = vmatpush.msra.mxu0 %v106_v41  ;;  %306 = vmatpush.msra.mxu1 %v106_v41 }
  0x9e   : > { %307 = vmatpush.msra.mxu2 %v106_v41  ;;  %308 = vmatpush.msra.mxu3 %v106_v41 }
  0x9f   : > { %135 = vmatpush.msra.mxu0 %v105_v43  ;;  %309 = vmatpush.msra.mxu1 %v105_v43 }
  0xa0   : > { %310 = vmatpush.msra.mxu2 %v105_v43  ;;  %311 = vmatpush.msra.mxu3 %v105_v43 }
  0xa1   : > { %136 = vmatpush.msra.mxu0 %v104_v44  ;;  %312 = vmatpush.msra.mxu1 %v104_v44 }
  0xa2   : > { %313 = vmatpush.msra.mxu2 %v104_v44  ;;  %314 = vmatpush.msra.mxu3 %v104_v44 }
  0xa3   : > { %298 = vmatmul.msk.f32.vlgmr.msra.gmra.mxu2 %vm108_vm12, %v457_v23  ;;  %299 = vmatmul.msk.f32.vlgmr.msra.gmra.mxu3 %vm108_vm12, %v459_v24 }
  0xa4   : > { %296 = vmatmul.msk.f32.vlgmr.msra.gmra.mxu0 %vm108_vm12, %v453_v21  ;;  %297 = vmatmul.msk.f32.vlgmr.msra.gmra.mxu1 %vm108_vm12, %v455_v22 }
 0x121   : > { %v138_v46 = vpop.f32.mrf.mxu0  ;;  %v141_v47 = vpop.f32.mrf.mxu1 }
 0x122   : > { %v150_v48 = vsub.f32 0.0, %v138_v46  ;;  %v151_v49 = vsub.f32 0.0, %v141_v47 }
 0x124   : > { %v154_v50 = vmul.f32 1.442695, %v150_v48  ;;  %v156_v51 = vmul.f32 1.442695, %v151_v49 }
 0x126   : > { %v144_v52 = vpop.f32.mrf.mxu2  ;;  %v147_v53 = vpop.f32.mrf.mxu3  ;;  %332 = vpow2.f32 %v154_v50 }
 0x127   : > { %v152_v54 = vsub.f32 0.0, %v144_v52  ;;  %v153_v55 = vsub.f32 0.0, %v147_v53  ;;  %334 = vpow2.f32 %v156_v51 }
 0x129   : > { %v158_v56 = vmul.f32 1.442695, %v152_v54  ;;  %v160_v57 = vmul.f32 1.442695, %v153_v55 }
 0x12b   : > { %336 = vpow2.f32 %v158_v56 }
 0x12c   : > { %v333_v58 = vpop.eup %332  ;;  %338 = vpow2.f32 %v160_v57 }
 0x12d   : > { %v335_v59 = vpop.eup %334  ;;  %v162_v60 = vadd.f32 1.0, %v333_v58 }
 0x12e   : > { %v163_v61 = vadd.f32 1.0, %v335_v59 }
 0x12f   : > { %340 = vrcp.f32 %v162_v60  ;;  %v177_v5 = vand.u32 2147483648, %v162_v60  ;;  %vm171_vm13 = vweird.f32 %v162_v60  ;;  %v175_v8 = vand.u32 2147483647, %v162_v60 }
 0x130   : > { %342 = vrcp.f32 %v163_v61  ;;  %vm186_vm0 = vweird.f32 %v163_v61  ;;  %v190_v28 = vand.u32 2147483647, %v163_v61  ;;  %v192_v30 = vand.u32 2147483648, %v163_v61 }
 0x131   : > { %v337_v62 = vpop.eup %336  ;;  %v178_v15 = vor.u32 1.1754944e-38, %v177_v5  ;;  %vm176_vm1 = vcmp.eq.f32.partialorder %v175_v8, 8.507059e+37 }
 0x132   : > { %v339_v63 = vpop.eup %338  ;;  %v164_v0 = vadd.f32 1.0, %v337_v62  ;;  %vm508_vm7 = vcmp.eq.f32.partialorder %v190_v28, 8.507059e+37  ;;  %v193_v47 = vor.u32 1.1754944e-38, %v192_v30 }
 0x133   : > { %v165_v1 = vadd.f32 1.0, %v339_v63 }
 0x134   : > { %344 = vrcp.f32 %v164_v0  ;;  %v205_v20 = vand.u32 2147483647, %v164_v0  ;;  %v207_v36 = vand.u32 2147483648, %v164_v0  ;;  %vm201_vm6 = vweird.f32 %v164_v0 }
 0x135   : > { %v341_v2 = vpop.eup %340  ;;  %346 = vrcp.f32 %v165_v1  ;;  %v222_v39 = vand.u32 2147483648, %v165_v1  ;;  %v220_v44 = vand.u32 2147483647, %v165_v1  ;;  %vm216_vm8 = vweird.f32 %v165_v1 }
 0x136   : > { %v343_v3 = vpop.eup %342  ;;  %v167_v4 = vmul.f32 %v341_v2, %v162_v60  ;;  %vm172_vm14 = vweird.f32 %v341_v2  ;;  %v208_v49 = vor.u32 1.1754944e-38, %v207_v36  ;;  %vm206_vm11 = vcmp.eq.f32.partialorder %v205_v20, 8.507059e+37 }
 0x137   : > { %v182_v6 = vmul.f32 %v343_v3, %v163_v61  ;;  %vm497_vm15 = vmor %vm171_vm13, %vm172_vm14  ;;  %vm187_vm2 = vweird.f32 %v343_v3  ;;  %v223_v51 = vor.u32 1.1754944e-38, %v222_v39  ;;  %vm221_vm12 = vcmp.eq.f32.partialorder %v220_v44, 8.507059e+37 }
 0x138   : > { %v168_v7 = vsub.f32 1.0, %v167_v4  ;;  %vm504_vm4 = vmor %vm186_vm0, %vm187_vm2 }
 0x139   : > { %v183_v9 = vsub.f32 1.0, %v182_v6 }
 0x13a   : > { %v345_v10 = vpop.eup %344  ;;  %v169_v11 = vmul.f32 %v341_v2, %v168_v7 }
 0x13b   : > { %v347_v12 = vpop.eup %346  ;;  %v197_v13 = vmul.f32 %v345_v10, %v164_v0  ;;  %v184_v16 = vmul.f32 %v343_v3, %v183_v9  ;;  %vm202_vm3 = vweird.f32 %v345_v10 }
 0x13c   : > { %v212_v17 = vmul.f32 %v347_v12, %v165_v1  ;;  %v170_v18 = vadd.f32 %v341_v2, %v169_v11  ;;  %vm217_vm5 = vweird.f32 %v347_v12  ;;  %vm203_vm9 = vmor %vm201_vm6, %vm202_vm3 }
 0x13d   : > { %v198_v19 = vsub.f32 1.0, %v197_v13  ;;  %v185_v38 = vadd.f32 %v343_v3, %v184_v16  ;;  %vm218_vm10 = vmor %vm216_vm8, %vm217_vm5 }
 0x13e   : > { %v213_v35 = vsub.f32 1.0, %v212_v17  ;;  %v174_v37 = vsel %vm497_vm15, %v341_v2, %v170_v18 }
 0x13f   : > { %v199_v40 = vmul.f32 %v345_v10, %v198_v19  ;;  %v179_v41 = vsel %vm176_vm1, %v178_v15, %v174_v37  ;;  %v189_v50 = vsel %vm504_vm4, %v343_v3, %v185_v38 }
 0x140   : > { %v214_v43 = vmul.f32 %v347_v12, %v213_v35  ;;  %228 = vperm.xlu2 %329, %v179_v41   ;;  %v194_v56 = vsel %vm508_vm7, %v193_v47, %v189_v50 }
 0x141   : > { %v200_v45 = vadd.f32 %v345_v10, %v199_v40 }
 0x142   : > { %v215_v48 = vadd.f32 %v347_v12, %v214_v43 }
 0x143   : > { %v204_v52 = vsel %vm203_vm9, %v345_v10, %v200_v45 }
 0x144   : > { %v219_v53 = vsel %vm218_vm10, %v347_v12, %v215_v48  ;;  %v209_v54 = vsel %vm206_vm11, %v208_v49, %v204_v52 }
 0x145   : > { %v224_v55 = vsel %vm221_vm12, %v223_v51, %v219_v53  ;;  %238 = vperm.xlu0 %330, %v209_v54  }
 0x146   : > { %243 = vperm.xlu1 %331, %v224_v55  }
 0x148   : > { %233 = vperm.xlu2 %329, %v194_v56  }
 0x19a   : > { %v229_v57 = vpop.permute.xlu2 %228 }
 0x19b   : > { %v246_v58 = vmul.f32 %v229_v57, %v485_v33  ;;  %v247_v59 = vmul.f32 %v229_v57, %v487_v34 }
 0x19d   : > { %256 = vst [vmem:[%s255_s24] sm:$0xff] %v246_v58 }
 0x19e   : > { %257 = vst [vmem:[%s255_s24 + $0x8] sm:$0xff] %v247_v59 }
 0x1a2   : > { %v234_v60 = vpop.permute.xlu2 %233 }
 0x1a3   : > { %v248_v61 = vmul.f32 %v234_v60, %v473_v27  ;;  %v249_v62 = vmul.f32 %v234_v60, %v477_v29 }
 0x1a5   : > { %258 = vst [vmem:[%s255_s24 + $0x10] sm:$0xff] %v248_v61 }
 0x1a6   : > { %259 = vst [vmem:[%s255_s24 + $0x18] sm:$0xff] %v249_v62 }
 0x1b7   : > { %v239_v63 = vpop.permute.xlu0 %238 }
 0x1b8   : > { %v244_v0 = vpop.permute.xlu1 %243  ;;  %v250_v1 = vmul.f32 %v239_v63, %v481_v31  ;;  %v251_v34 = vmul.f32 %v239_v63, %v483_v32 }
 0x1b9   : > { %v252_v2 = vmul.f32 %v244_v0, %v469_v25  ;;  %v253_v33 = vmul.f32 %v244_v0, %v471_v26  ;;  %79 = sbr.rel (!%p77_p0) target bundleno = 26 (0x1a), region = 37 }
 0x1ba   : > { %260 = vst [vmem:[%s255_s24 + $0x20] sm:$0xff] %v250_v1 }
 0x1bb   : > { %262 = vst [vmem:[%s255_s24 + $0x30] sm:$0xff] %v252_v2 }
 0x1bc   : > { %263 = vst [vmem:[%s255_s24 + $0x38] sm:$0xff] %v253_v33 }
 0x1bd   : > { %261 = vst [vmem:[%s255_s24 + $0x28] sm:$0xff] %v251_v34 }
 0x1be   :  { %276 = dma.vmem_to_hbm [thread:$0]  %s269_s29, 2048, %s271_s27, [#allocation6], %s424_s18, %s424_s18, %s425_s19  }
 0x1bf   :  { %416 = dma.done.wait [#allocation6], 2048  }
 0x1c0   :  { %417 = vsyncadd [#allocation6], 4294965248 }
 0x1c1   :  { %281 = vsyncpa [#allocation5], 1 }
 0x1c2   :  { %282 = vsyncpa [#allocation6], 1 }

</bundles_post_ra>
